<compile_context>
chip_gen: v5e
topology: v5e:2x2
jax: 0.10.0
libtpu: 0.0.40
codegen_flags: <defaults>
</compile_context>

<pallas_src>
import functools

import jax
import jax.numpy as jnp
from jax.experimental import pallas as pl
from jax.experimental.pallas import tpu as pltpu


def _label_smoothing_kernel(preds_ref, tgt_ref, loss_out_ref, nll_out_ref,
                            loss_acc, nll_acc, *,
                            n_rows, n_classes, tile_rows, steps_per_core,
                            any_ragged, use_native_dot):
    c_idx = pl.program_id(0)        # core-parallel axis
    s_idx = pl.program_id(1)        # per-core reduction axis ("arbitrary")

    @pl.when(s_idx == 0)
    def _():
        loss_acc[...] = jnp.zeros_like(loss_acc)
        nll_acc[...] = jnp.zeros_like(nll_acc)

    x_native = preds_ref[...]       # (TN, C), HBM dtype (f32 or bf16)
    tgt = tgt_ref[...]              # (TN, 1) int32

    c_f = float(n_classes)

    def tile_contrib(xn, valid):
        """Partial sums of -sum_c(log_preds) and -log_preds[i, tgt_i] for one tile."""
        x = xn.astype(jnp.float32)
        # log_softmax pieces; log_preds itself is never materialized.
        m = jnp.max(x, axis=-1, keepdims=True)                           # XLU
        lse = jnp.log(jnp.sum(jnp.exp(x - m), axis=-1, keepdims=True))   # EUP+XLU
        col = jax.lax.broadcasted_iota(jnp.int32, xn.shape, 1)
        if use_native_dot:
            # bf16 fast path: single-pass MXU dots; ones RHS keeps products exact.
            ones = jnp.ones((n_classes, 1), xn.dtype)
            sum_x = jnp.dot(xn, ones, preferred_element_type=jnp.float32)
            masked = jnp.where(col == tgt, xn, jnp.zeros((), xn.dtype))
            picked_x = jnp.dot(masked, ones, preferred_element_type=jnp.float32)
        else:
            # f32 path: accurate multi-pass dot for the class-sum; keep the
            # one-hot pick on the XLU (a second HIGHEST dot is mostly VPU cost).
            ones = jnp.ones((n_classes, 1), jnp.float32)
            sum_x = jnp.dot(x, ones, precision=jax.lax.Precision.HIGHEST,
                            preferred_element_type=jnp.float32)
            picked_x = jnp.sum(jnp.where(col == tgt, x, 0.0), axis=-1,
                               keepdims=True)
        # -sum_c(log_preds) per row, where log_preds = x - m - lse + 1e-6.
        row_neg_sum = -(sum_x - c_f * (m + lse) + c_f * 1e-6)            # (TN, 1)
        picked_lp = picked_x - m - lse + 1e-6                            # (TN, 1)
        if valid is None:
            loss_c = jnp.sum(row_neg_sum, axis=0, keepdims=True)         # (1, 1)
            nll_c = jnp.sum(-picked_lp, axis=0, keepdims=True)           # (1, 1)
        else:
            vf = valid.astype(jnp.float32)
            loss_c = jnp.sum(row_neg_sum * vf, axis=0, keepdims=True)
            nll_c = jnp.sum(-picked_lp * vf, axis=0, keepdims=True)
        return loss_c, nll_c

    global_tile = c_idx * steps_per_core + s_idx

    if not any_ragged:
        loss_c, nll_c = tile_contrib(x_native, None)
        loss_acc[...] += loss_c
        nll_acc[...] += nll_c
    else:
        needs_mask = (global_tile + 1) * tile_rows > n_rows

        @pl.when(jnp.logical_not(needs_mask))
        def _():
            lc, nc = tile_contrib(x_native, None)
            loss_acc[...] += lc
            nll_acc[...] += nc

        @pl.when(needs_mask)
        def _():
            row_ids = (global_tile * tile_rows
                       + jax.lax.broadcasted_iota(jnp.int32, (tile_rows, 1), 0))
            valid = row_ids < n_rows
            # Zero invalid rows BEFORE max/exp so garbage can't become inf/NaN.
            xn = jnp.where(valid, x_native, jnp.zeros((), x_native.dtype))
            lc, nc = tile_contrib(xn, valid)
            loss_acc[...] += lc
            nll_acc[...] += nc

    @pl.when(s_idx == pl.num_programs(1) - 1)
    def _():
        loss_out_ref[0] = loss_acc[...]        # per-core partial sums
        nll_out_ref[0] = nll_acc[...]


def label_smoothing_loss(preds, target, smoothing=0.1, tile_rows=None,
                         num_cores=2):
    """preds: (N, C) float logits, target: (N,) int class ids. Returns scalar loss."""
    assert 0.0 <= smoothing < 1.0
    n, c = preds.shape
    tgt2d = target.astype(jnp.int32).reshape(n, 1)

    itemsize = preds.dtype.itemsize
    # Sublane packing multiple: 8 for 4-byte, 16 for 2-byte, 32 for 1-byte dtypes.
    sub_mult = max(8, 32 // max(1, itemsize))
    bytes_per_row = c * itemsize

    if tile_rows is None:
        # ~4 MiB per double-buffered preds buffer: amortizes per-step overhead
        # while leaving room for the f32 upcast / exp intermediates and the
        # lane-padded (TN,1) targets/stats under v7x's 64 MiB physical VMEM.
        budget = 4 * 1024 * 1024
        tile_rows = budget // max(1, bytes_per_row)
    tile_rows = min(int(tile_rows), 2048)          # cap lane-padded (TN,1) cost
    if tile_rows >= n:
        tile_rows = n                              # single full tile, any N
    else:
        tile_rows = max(sub_mult, (tile_rows // sub_mult) * sub_mult)
    tile_rows = int(tile_rows)

    total_tiles = int(pl.cdiv(n, tile_rows))
    # Megacore split of the row-tiles across TensorCores (leading "parallel" axis).
    num_cores = int(num_cores) if total_tiles >= 2 else 1
    steps_per_core = int(pl.cdiv(total_tiles, num_cores))
    padded_tiles = num_cores * steps_per_core
    any_ragged = padded_tiles * tile_rows > n
    last_tile = total_tiles - 1

    def row_index_map(ci, si):
        # Clamp phantom tiles (padding from the core split) onto the last real
        # tile so the DMA window always starts in bounds; their contribution is
        # masked to zero inside the kernel.
        return (jnp.minimum(ci * steps_per_core + si, last_tile), 0)

    kernel = functools.partial(
        _label_smoothing_kernel,
        n_rows=int(n), n_classes=int(c), tile_rows=tile_rows,
        steps_per_core=steps_per_core, any_ragged=bool(any_ragged),
        use_native_dot=(preds.dtype == jnp.dtype(jnp.bfloat16)),
    )

    loss_part, nll_part = pl.pallas_call(
        kernel,
        out_shape=(jax.ShapeDtypeStruct((num_cores, 1, 1), jnp.float32),
                   jax.ShapeDtypeStruct((num_cores, 1, 1), jnp.float32)),
        grid_spec=pltpu.PrefetchScalarGridSpec(
            num_scalar_prefetch=0,
            grid=(num_cores, steps_per_core),
            in_specs=[
                pl.BlockSpec((tile_rows, c), row_index_map),   # preds tiles (pipelined)
                pl.BlockSpec((tile_rows, 1), row_index_map),   # targets
            ],
            out_specs=[
                pl.BlockSpec((1, 1, 1), lambda ci, si: (ci, 0, 0)),  # per-core loss sum
                pl.BlockSpec((1, 1, 1), lambda ci, si: (ci, 0, 0)),  # per-core nll sum
            ],
            scratch_shapes=[pltpu.VMEM((1, 1), jnp.float32),   # running sum -sum_c(log_preds)
                            pltpu.VMEM((1, 1), jnp.float32)],  # running sum -log_preds[i, t_i]
        ),
        compiler_params=pltpu.CompilerParams(
            dimension_semantics=("parallel", "arbitrary"),
            vmem_limit_bytes=48 * 1024 * 1024,
        ),
        cost_estimate=pl.CostEstimate(
            flops=6 * n * c,
            transcendentals=n * c,
            bytes_accessed=n * c * itemsize + n * 4 + 2 * num_cores * 4,
        ),
    )(preds, tgt2d)

    # Final combine in the wrapper: sum per-core partials, divide by N, smooth.
    loss_mean = jnp.sum(loss_part) / float(n)
    nll_mean = jnp.sum(nll_part) / float(n)
    return smoothing * (loss_mean / float(c)) + (1.0 - smoothing) * nll_mean


def _reference(preds, target, smoothing=0.1):
    # Pure-JAX reference mirroring the PyTorch module.
    c = preds.shape[-1]
    log_preds = jax.nn.log_softmax(preds.astype(jnp.float32), axis=-1) + 1e-06
    loss = jnp.mean(-jnp.sum(log_preds, axis=-1))
    nll = jnp.mean(-jnp.take_along_axis(log_preds, target[:, None], axis=-1)[:, 0])
    return smoothing * (loss / c) + (1.0 - smoothing) * nll


if __name__ == "__main__":
    key = jax.random.PRNGKey(0)
    k1, k2 = jax.random.split(key)

    # f32 path: 24 rows over 16-row tiles -> 2 tiles split across the 2-way
    # parallel axis; core 1 gets the ragged tile (exercises the masked branch).
    N, C = 24, 128
    preds = jax.random.normal(k1, (N, C), dtype=jnp.float32)
    target = jax.random.randint(k2, (N,), 0, C, dtype=jnp.int32)

    out = label_smoothing_loss(preds, target, smoothing=0.1, tile_rows=16)
    out = jax.block_until_ready(out)
    ref = _reference(preds, target, smoothing=0.1)
    assert jnp.allclose(out, ref, atol=1e-4, rtol=1e-4), (out, ref)

    # bf16 fast path + phantom-tile coverage: 40 rows -> 3 real tiles, padded to
    # 4 by the 2-core split (last tile on core 1 is fully masked).
    N2 = 40
    preds_bf = jax.random.normal(k1, (N2, C), dtype=jnp.float32).astype(jnp.bfloat16)
    target2 = jax.random.randint(k2, (N2,), 0, C, dtype=jnp.int32)
    out2 = label_smoothing_loss(preds_bf, target2, smoothing=0.1, tile_rows=16)
    out2 = jax.block_until_ready(out2)
    ref2 = _reference(preds_bf.astype(jnp.float32), target2, smoothing=0.1)
    assert jnp.allclose(out2, ref2, atol=1e-3, rtol=1e-3), (out2, ref2)

    print("KERNEL_OK")
</pallas_src>

<mosaic_0001>
module attributes {stable_mosaic.version = 11 : i64} {
  func.func @_label_smoothing_kernel(%arg0: i32, %arg1: i32, %arg2: memref<16x128xf32, #tpu.memory_space<vmem>>, %arg3: memref<16x1xi32, #tpu.memory_space<vmem>>, %arg4: memref<1x1x1xf32, #tpu.memory_space<vmem>>, %arg5: memref<1x1x1xf32, #tpu.memory_space<vmem>>, %arg6: memref<1x1xf32, #tpu.memory_space<vmem>>, %arg7: memref<1x1xf32, #tpu.memory_space<vmem>>) attributes {dimension_semantics = [#tpu.dimension_semantics<parallel>, #tpu.dimension_semantics<arbitrary>], iteration_bounds = array<i64: 2, 1>, scalar_prefetch = 0 : i64, scratch_operands = 2 : i64, tpu.core_type = #tpu.core_type<tc>, window_params = [{transform_indices = @transform_0, window_bounds = array<i64: 16, 128>}, {transform_indices = @transform_1, window_bounds = array<i64: 16, 1>}, {transform_indices = @transform_2, window_bounds = array<i64: 1, 1, 1>}, {transform_indices = @transform_3, window_bounds = array<i64: 1, 1, 1>}]} {
    %c0_i32 = arith.constant 0 : i32
    %0 = arith.cmpi eq, %arg1, %c0_i32 : i32
    %1 = arith.extui %0 : i1 to i32
    %c0_i32_0 = arith.constant 0 : i32
    %2 = arith.cmpi ne, %1, %c0_i32_0 : i32
    scf.if %2 {
      %cst = arith.constant 0.000000e+00 : f32
      %18 = vector.broadcast %cst : f32 to vector<1x1xf32>
      %c0_9 = arith.constant 0 : index
      %c0_10 = arith.constant 0 : index
      %19 = vector.load %arg6[%c0_9, %c0_10] : memref<1x1xf32, #tpu.memory_space<vmem>>, vector<1x1xf32>
      tpu.vector_store %arg6[%c0_9, %c0_10], %18 {strides = array<i32>} : memref<1x1xf32, #tpu.memory_space<vmem>>, vector<1x1xf32>,
      %cst_11 = arith.constant 0.000000e+00 : f32
      %20 = vector.broadcast %cst_11 : f32 to vector<1x1xf32>
      %c0_12 = arith.constant 0 : index
      %c0_13 = arith.constant 0 : index
      %21 = vector.load %arg7[%c0_12, %c0_13] : memref<1x1xf32, #tpu.memory_space<vmem>>, vector<1x1xf32>
      tpu.vector_store %arg7[%c0_12, %c0_13], %20 {strides = array<i32>} : memref<1x1xf32, #tpu.memory_space<vmem>>, vector<1x1xf32>,
    } else {
    }
    %c0 = arith.constant 0 : index
    %c0_1 = arith.constant 0 : index
    %3 = vector.load %arg2[%c0, %c0_1] : memref<16x128xf32, #tpu.memory_space<vmem>>, vector<16x128xf32>
    %c0_2 = arith.constant 0 : index
    %c0_3 = arith.constant 0 : index
    %4 = vector.load %arg3[%c0_2, %c0_3] : memref<16x1xi32, #tpu.memory_space<vmem>>, vector<16x1xi32>
    %c1_i32 = arith.constant 1 : i32
    %5 = arith.muli %arg0, %c1_i32 : i32
    %6 = arith.addi %5, %arg1 : i32
    %c1_i32_4 = arith.constant 1 : i32
    %7 = arith.addi %6, %c1_i32_4 : i32
    %c16_i32 = arith.constant 16 : i32
    %8 = arith.muli %7, %c16_i32 : i32
    %c24_i32 = arith.constant 24 : i32
    %9 = arith.cmpi sgt, %8, %c24_i32 : i32
    %true = arith.constant true
    %10 = arith.xori %9, %true : i1
    %11 = arith.extui %10 : i1 to i32
    %c0_i32_5 = arith.constant 0 : i32
    %12 = arith.cmpi ne, %11, %c0_i32_5 : i32
    scf.if %12 {
      %cst = arith.constant dense<0xFF800000> : vector<16xf32>
      %18 = vector.multi_reduction <maximumf>, %3, %cst [1] : vector<16x128xf32> to vector<16xf32>
      %19 = vector.shape_cast %18 : vector<16xf32> to vector<16x1xf32>
      %20 = vector.broadcast %19 : vector<16x1xf32> to vector<16x128xf32>
      %21 = arith.subf %3, %20 : vector<16x128xf32>
      %22 = math.exp %21 : vector<16x128xf32>
      %cst_9 = arith.constant dense<0.000000e+00> : vector<16xf32>
      %23 = vector.multi_reduction <add>, %22, %cst_9 [1] : vector<16x128xf32> to vector<16xf32>
      %24 = vector.shape_cast %23 : vector<16xf32> to vector<16x1xf32>
      %25 = math.log %24 : vector<16x1xf32>
      %26 = tpu.iota {dimensions = array<i32: 1>} : vector<16x128xi32>
      %cst_10 = arith.constant 1.000000e+00 : f32
      %27 = vector.broadcast %cst_10 : f32 to vector<128x1xf32>
      %cst_11 = arith.constant dense<0.000000e+00> : vector<16x1xf32>
      %28 = tpu.matmul %3, %27, %cst_11 {dimension_numbers = #tpu.dot_dimension_numbers<[1], [0], [0], [1], [0, 0, 1, 1], [], []>, precision = #tpu.contract_precision<fp32>} : vector<16x128xf32>, vector<128x1xf32>, vector<16x1xf32> -> vector<16x1xf32>
      %29 = vector.broadcast %4 : vector<16x1xi32> to vector<16x128xi32>
      %30 = arith.cmpi eq, %26, %29 : vector<16x128xi32>
      %cst_12 = arith.constant 0.000000e+00 : f32
      %31 = vector.broadcast %cst_12 : f32 to vector<16x128xf32>
      %32 = arith.select %30, %3, %31 : vector<16x128xi1>, vector<16x128xf32>
      %cst_13 = arith.constant dense<0.000000e+00> : vector<16xf32>
      %33 = vector.multi_reduction <add>, %32, %cst_13 [1] : vector<16x128xf32> to vector<16xf32>
      %34 = vector.shape_cast %33 : vector<16xf32> to vector<16x1xf32>
      %35 = arith.addf %19, %25 : vector<16x1xf32>
      %cst_14 = arith.constant 1.280000e+02 : f32
      %36 = vector.broadcast %cst_14 : f32 to vector<16x1xf32>
      %37 = arith.mulf %36, %35 : vector<16x1xf32>
      %38 = arith.subf %28, %37 : vector<16x1xf32>
      %cst_15 = arith.constant 1.280000e-04 : f32
      %39 = vector.broadcast %cst_15 : f32 to vector<16x1xf32>
      %40 = arith.addf %38, %39 : vector<16x1xf32>
      %cst_16 = arith.constant 0.000000e+00 : f32
      %41 = vector.broadcast %cst_16 : f32 to vector<16x1xf32>
      %42 = arith.subf %41, %40 : vector<16x1xf32>
      %43 = arith.subf %34, %19 : vector<16x1xf32>
      %44 = arith.subf %43, %25 : vector<16x1xf32>
      %cst_17 = arith.constant 9.99999997E-7 : f32
      %45 = vector.broadcast %cst_17 : f32 to vector<16x1xf32>
      %46 = arith.addf %44, %45 : vector<16x1xf32>
      %cst_18 = arith.constant dense<0.000000e+00> : vector<1xf32>
      %47 = vector.multi_reduction <add>, %42, %cst_18 [0] : vector<16x1xf32> to vector<1xf32>
      %48 = vector.shape_cast %47 : vector<1xf32> to vector<1x1xf32>
      %cst_19 = arith.constant 0.000000e+00 : f32
      %49 = vector.broadcast %cst_19 : f32 to vector<16x1xf32>
      %50 = arith.subf %49, %46 : vector<16x1xf32>
      %cst_20 = arith.constant dense<0.000000e+00> : vector<1xf32>
      %51 = vector.multi_reduction <add>, %50, %cst_20 [0] : vector<16x1xf32> to vector<1xf32>
      %52 = vector.shape_cast %51 : vector<1xf32> to vector<1x1xf32>
      %c0_21 = arith.constant 0 : index
      %c0_22 = arith.constant 0 : index
      %53 = vector.load %arg6[%c0_21, %c0_22] : memref<1x1xf32, #tpu.memory_space<vmem>>, vector<1x1xf32>
      %54 = arith.addf %53, %48 : vector<1x1xf32>
      %c0_23 = arith.constant 0 : index
      %c0_24 = arith.constant 0 : index
      %55 = vector.load %arg6[%c0_23, %c0_24] : memref<1x1xf32, #tpu.memory_space<vmem>>, vector<1x1xf32>
      tpu.vector_store %arg6[%c0_23, %c0_24], %54 {strides = array<i32>} : memref<1x1xf32, #tpu.memory_space<vmem>>, vector<1x1xf32>,
      %c0_25 = arith.constant 0 : index
      %c0_26 = arith.constant 0 : index
      %56 = vector.load %arg7[%c0_25, %c0_26] : memref<1x1xf32, #tpu.memory_space<vmem>>, vector<1x1xf32>
      %57 = arith.addf %56, %52 : vector<1x1xf32>
      %c0_27 = arith.constant 0 : index
      %c0_28 = arith.constant 0 : index
      %58 = vector.load %arg7[%c0_27, %c0_28] : memref<1x1xf32, #tpu.memory_space<vmem>>, vector<1x1xf32>
      tpu.vector_store %arg7[%c0_27, %c0_28], %57 {strides = array<i32>} : memref<1x1xf32, #tpu.memory_space<vmem>>, vector<1x1xf32>,
    } else {
    }
    %13 = arith.extui %9 : i1 to i32
    %c0_i32_6 = arith.constant 0 : i32
    %14 = arith.cmpi ne, %13, %c0_i32_6 : i32
    scf.if %14 {
      %c16_i32_9 = arith.constant 16 : i32
      %18 = arith.muli %6, %c16_i32_9 : i32
      %19 = tpu.iota {dimensions = array<i32: 0>} : vector<16x1xi32>
      %20 = vector.broadcast %18 : i32 to vector<16x1xi32>
      %21 = arith.addi %20, %19 : vector<16x1xi32>
      %c24_i32_10 = arith.constant 24 : i32
      %22 = vector.broadcast %c24_i32_10 : i32 to vector<16x1xi32>
      %23 = arith.cmpi slt, %21, %22 : vector<16x1xi32>
      %cst = arith.constant 0.000000e+00 : f32
      %24 = vector.shape_cast %23 : vector<16x1xi1> to vector<16x1xi1>
      %25 = vector.broadcast %24 : vector<16x1xi1> to vector<16x128xi1>
      %26 = vector.broadcast %cst : f32 to vector<16x128xf32>
      %27 = arith.select %25, %3, %26 : vector<16x128xi1>, vector<16x128xf32>
      %cst_11 = arith.constant dense<0xFF800000> : vector<16xf32>
      %28 = vector.multi_reduction <maximumf>, %27, %cst_11 [1] : vector<16x128xf32> to vector<16xf32>
      %29 = vector.shape_cast %28 : vector<16xf32> to vector<16x1xf32>
      %30 = vector.broadcast %29 : vector<16x1xf32> to vector<16x128xf32>
      %31 = arith.subf %27, %30 : vector<16x128xf32>
      %32 = math.exp %31 : vector<16x128xf32>
      %cst_12 = arith.constant dense<0.000000e+00> : vector<16xf32>
      %33 = vector.multi_reduction <add>, %32, %cst_12 [1] : vector<16x128xf32> to vector<16xf32>
      %34 = vector.shape_cast %33 : vector<16xf32> to vector<16x1xf32>
      %35 = math.log %34 : vector<16x1xf32>
      %36 = tpu.iota {dimensions = array<i32: 1>} : vector<16x128xi32>
      %cst_13 = arith.constant 1.000000e+00 : f32
      %37 = vector.broadcast %cst_13 : f32 to vector<128x1xf32>
      %cst_14 = arith.constant dense<0.000000e+00> : vector<16x1xf32>
      %38 = tpu.matmul %27, %37, %cst_14 {dimension_numbers = #tpu.dot_dimension_numbers<[1], [0], [0], [1], [0, 0, 1, 1], [], []>, precision = #tpu.contract_precision<fp32>} : vector<16x128xf32>, vector<128x1xf32>, vector<16x1xf32> -> vector<16x1xf32>
      %39 = vector.broadcast %4 : vector<16x1xi32> to vector<16x128xi32>
      %40 = arith.cmpi eq, %36, %39 : vector<16x128xi32>
      %cst_15 = arith.constant 0.000000e+00 : f32
      %41 = vector.broadcast %cst_15 : f32 to vector<16x128xf32>
      %42 = arith.select %40, %27, %41 : vector<16x128xi1>, vector<16x128xf32>
      %cst_16 = arith.constant dense<0.000000e+00> : vector<16xf32>
      %43 = vector.multi_reduction <add>, %42, %cst_16 [1] : vector<16x128xf32> to vector<16xf32>
      %44 = vector.shape_cast %43 : vector<16xf32> to vector<16x1xf32>
      %45 = arith.addf %29, %35 : vector<16x1xf32>
      %cst_17 = arith.constant 1.280000e+02 : f32
      %46 = vector.broadcast %cst_17 : f32 to vector<16x1xf32>
      %47 = arith.mulf %46, %45 : vector<16x1xf32>
      %48 = arith.subf %38, %47 : vector<16x1xf32>
      %cst_18 = arith.constant 1.280000e-04 : f32
      %49 = vector.broadcast %cst_18 : f32 to vector<16x1xf32>
      %50 = arith.addf %48, %49 : vector<16x1xf32>
      %cst_19 = arith.constant 0.000000e+00 : f32
      %51 = vector.broadcast %cst_19 : f32 to vector<16x1xf32>
      %52 = arith.subf %51, %50 : vector<16x1xf32>
      %53 = arith.subf %44, %29 : vector<16x1xf32>
      %54 = arith.subf %53, %35 : vector<16x1xf32>
      %cst_20 = arith.constant 9.99999997E-7 : f32
      %55 = vector.broadcast %cst_20 : f32 to vector<16x1xf32>
      %56 = arith.addf %54, %55 : vector<16x1xf32>
      %57 = arith.extui %23 : vector<16x1xi1> to vector<16x1xi32>
      %58 = arith.sitofp %57 : vector<16x1xi32> to vector<16x1xf32>
      %59 = arith.mulf %52, %58 : vector<16x1xf32>
      %cst_21 = arith.constant dense<0.000000e+00> : vector<1xf32>
      %60 = vector.multi_reduction <add>, %59, %cst_21 [0] : vector<16x1xf32> to vector<1xf32>
      %61 = vector.shape_cast %60 : vector<1xf32> to vector<1x1xf32>
      %cst_22 = arith.constant 0.000000e+00 : f32
      %62 = vector.broadcast %cst_22 : f32 to vector<16x1xf32>
      %63 = arith.subf %62, %56 : vector<16x1xf32>
      %64 = arith.mulf %63, %58 : vector<16x1xf32>
      %cst_23 = arith.constant dense<0.000000e+00> : vector<1xf32>
      %65 = vector.multi_reduction <add>, %64, %cst_23 [0] : vector<16x1xf32> to vector<1xf32>
      %66 = vector.shape_cast %65 : vector<1xf32> to vector<1x1xf32>
      %c0_24 = arith.constant 0 : index
      %c0_25 = arith.constant 0 : index
      %67 = vector.load %arg6[%c0_24, %c0_25] : memref<1x1xf32, #tpu.memory_space<vmem>>, vector<1x1xf32>
      %68 = arith.addf %67, %61 : vector<1x1xf32>
      %c0_26 = arith.constant 0 : index
      %c0_27 = arith.constant 0 : index
      %69 = vector.load %arg6[%c0_26, %c0_27] : memref<1x1xf32, #tpu.memory_space<vmem>>, vector<1x1xf32>
      tpu.vector_store %arg6[%c0_26, %c0_27], %68 {strides = array<i32>} : memref<1x1xf32, #tpu.memory_space<vmem>>, vector<1x1xf32>,
      %c0_28 = arith.constant 0 : index
      %c0_29 = arith.constant 0 : index
      %70 = vector.load %arg7[%c0_28, %c0_29] : memref<1x1xf32, #tpu.memory_space<vmem>>, vector<1x1xf32>
      %71 = arith.addf %70, %66 : vector<1x1xf32>
      %c0_30 = arith.constant 0 : index
      %c0_31 = arith.constant 0 : index
      %72 = vector.load %arg7[%c0_30, %c0_31] : memref<1x1xf32, #tpu.memory_space<vmem>>, vector<1x1xf32>
      tpu.vector_store %arg7[%c0_30, %c0_31], %71 {strides = array<i32>} : memref<1x1xf32, #tpu.memory_space<vmem>>, vector<1x1xf32>,
    } else {
    }
    %c0_i32_7 = arith.constant 0 : i32
    %15 = arith.cmpi eq, %arg1, %c0_i32_7 : i32
    %16 = arith.extui %15 : i1 to i32
    %c0_i32_8 = arith.constant 0 : i32
    %17 = arith.cmpi ne, %16, %c0_i32_8 : i32
    scf.if %17 {
      %c0_9 = arith.constant 0 : index
      %c0_10 = arith.constant 0 : index
      %18 = vector.load %arg6[%c0_9, %c0_10] : memref<1x1xf32, #tpu.memory_space<vmem>>, vector<1x1xf32>
      %c0_11 = arith.constant 0 : index
      %c0_12 = arith.constant 0 : index
      %c0_13 = arith.constant 0 : index
      %19 = vector.load %arg4[%c0_11, %c0_12, %c0_13] : memref<1x1x1xf32, #tpu.memory_space<vmem>>, vector<1x1x1xf32>
      %20 = vector.shape_cast %19 : vector<1x1x1xf32> to vector<1x1xf32>
      %21 = vector.shape_cast %18 : vector<1x1xf32> to vector<1x1x1xf32>
      tpu.vector_store %arg4[%c0_11, %c0_12, %c0_13], %21 {strides = array<i32>} : memref<1x1x1xf32, #tpu.memory_space<vmem>>, vector<1x1x1xf32>,
      %c0_14 = arith.constant 0 : index
      %c0_15 = arith.constant 0 : index
      %22 = vector.load %arg7[%c0_14, %c0_15] : memref<1x1xf32, #tpu.memory_space<vmem>>, vector<1x1xf32>
      %c0_16 = arith.constant 0 : index
      %c0_17 = arith.constant 0 : index
      %c0_18 = arith.constant 0 : index
      %23 = vector.load %arg5[%c0_16, %c0_17, %c0_18] : memref<1x1x1xf32, #tpu.memory_space<vmem>>, vector<1x1x1xf32>
      %24 = vector.shape_cast %23 : vector<1x1x1xf32> to vector<1x1xf32>
      %25 = vector.shape_cast %22 : vector<1x1xf32> to vector<1x1x1xf32>
      tpu.vector_store %arg5[%c0_16, %c0_17, %c0_18], %25 {strides = array<i32>} : memref<1x1x1xf32, #tpu.memory_space<vmem>>, vector<1x1x1xf32>,
    } else {
    }
    return
  }
  func.func @transform_0(%arg0: i32, %arg1: i32) -> (i32, i32) {
    %c1_i32 = arith.constant 1 : i32
    %0 = arith.muli %arg0, %c1_i32 : i32
    %1 = arith.addi %0, %arg1 : i32
    %c1_i32_0 = arith.constant 1 : i32
    %2 = arith.minsi %1, %c1_i32_0 : i32
    %c0_i32 = arith.constant 0 : i32
    %c0_i32_1 = arith.constant 0 : i32
    return %2, %c0_i32 : i32, i32
  }
  func.func @transform_1(%arg0: i32, %arg1: i32) -> (i32, i32) {
    %c1_i32 = arith.constant 1 : i32
    %0 = arith.muli %arg0, %c1_i32 : i32
    %1 = arith.addi %0, %arg1 : i32
    %c1_i32_0 = arith.constant 1 : i32
    %2 = arith.minsi %1, %c1_i32_0 : i32
    %c0_i32 = arith.constant 0 : i32
    %c0_i32_1 = arith.constant 0 : i32
    return %2, %c0_i32 : i32, i32
  }
  func.func @transform_2(%arg0: i32, %arg1: i32) -> (i32, i32, i32) {
    %c0_i32 = arith.constant 0 : i32
    %c0_i32_0 = arith.constant 0 : i32
    %c0_i32_1 = arith.constant 0 : i32
    return %arg0, %c0_i32, %c0_i32_0 : i32, i32, i32
  }
  func.func @transform_3(%arg0: i32, %arg1: i32) -> (i32, i32, i32) {
    %c0_i32 = arith.constant 0 : i32
    %c0_i32_0 = arith.constant 0 : i32
    %c0_i32_1 = arith.constant 0 : i32
    return %arg0, %c0_i32, %c0_i32_0 : i32, i32, i32
  }
}

</mosaic_0001>

<bundles_post_ra>
// kernel: tpu_custom_call.1
= control target key start
LH: loop header
LB: loop body
LE: loop exit
PB: predicated region body
PF: predicated region fallthrough
CT: control target
= control target key end

     0   :  { %s1038_s12 = smov 0   ;;  %s1040_s13 = smov 0   ;;  %s1274_s0 = inlined_call_operand.vmem [shape: f32[24,128], index: 0, kind: input, shape index: {}]   ;;  %s1275_s1 = inlined_call_operand.vmem [shape: s32[24,1], index: 1, kind: input, shape index: {}]   ;;  %s1276_s2 = inlined_call_operand.vmem [shape: f32[2,1,1], index: 2, kind: output, shape index: {0}]   ;;  %s1277_s3 = inlined_call_operand.vmem [shape: f32[2,1,1], index: 3, kind: output, shape index: {1}]  }
   0x1   :  { %s1042_s14 = smov 0  }
   0x2 LB: > { %s26_s15 = sadd.s32 1, %s1005_s13  ;;  %p921_p0 = scmp.ge.s32.totalorder %s1009_s14, 1  ;;  %s1009_s14 = sphi %s1042_s14, %s14_s14   ;;  %s1005_s13 = sphi %s1040_s13, %s1279_s13   ;;  %s1001_s12 = sphi %s1038_s12, %s1278_s12  }
   0x3   : > { %p28_p1 = scmp.ge.s32.totalorder %s26_s15, 2  ;;  %p204_p2 = scmp.lt.s32.totalorder %s1009_s14, 3 }
   0x5   : > { %s1281_s15 = smov (%p28_p1, %s26_s15), 0  ;;  %p205_p3 = pnand %p921_p0, %p204_p2 }
   0x6   : > { %p249_p4 = scmp.lt.s32.totalorder (!%p205_p3), %s1001_s12, 1  ;;  %s934_s16 = sshll.u32 (!%p205_p3), %s1001_s12, 4 }
   0x7   : > { %208 = sbr.rel (%p205_p3) target bundleno = 623 (0x26f), region = 28  ;;  %s1063_s17 = sadd.s32 (!%p205_p3), 16, %s934_s16 }
   0x8   : > { %p927_p6 = scmp.gt.s32.totalorder (!%p205_p3), %s1063_s17, 24 }
   0xc   : > { %vm298_vm0 = vcmask 0   ;;  %v1011_v0 = vmov 0.0   ;;  %s1066_s18 = scalar_select %p249_p4, %s1001_s12, 1 }
   0xd   : > { %299 = vst.msk [vmem:[#allocation2] sm:$0x1] %vm298_vm0, %v1011_v0 }
   0xe   : > { %300 = vst.msk [vmem:[#allocation3] sm:$0x1] %vm298_vm0, %v1011_v0  ;;  %s922_s19 = sshll.u32 %s1066_s18, 1  ;;  %s290_s22 = scalar_lea.vmem %s1276_s2, %s1066_s18 }
   0xf   : > { %p256_p5 = scmp.lt.s32.totalorder %s922_s19, 2  ;;  %s293_s25 = scalar_lea.vmem %s1277_s3, %s1066_s18 }
  0x11   : > { %s1283_s19 = smov (!%p256_p5, %s922_s19), 2  ;;  %312 = sbr.rel (%p927_p6) target bundleno = 310 (0x136), region = 36 }
  0x12   : > { %s923_s26 = sshll.u32 %s1283_s19, 3 }
  0x13   : > { %s259_s29 = scalar_lea.vmem %s1274_s0, %s923_s26  ;;  %s279_s5 = scalar_lea.vmem %s1275_s1, %s923_s26 }
  0x14   : > { %v1084_v1 = vld [vmem:[%s259_s29] sm:$0xff]  ;;  %v1086_v2 = vld [vmem:[%s259_s29 + $0x8] sm:$0xff] }
  0x15   : > { %v1088_v3 = vld [vmem:[%s279_s5] sm:$0xff]  ;;  %v1090_v4 = vld [vmem:[%s279_s5 + $0x8] sm:$0xff] }
  0x16   : > { %313 = vmax.xlane.f32.xlu0 %v1084_v1  ;;  %v1095_v5 = vand.u32 4294901760, %v1084_v1  ;;  %v1012_v6 = vmov 0   ;;  %v1013_v7 = vmov 1.0   ;;  %v1014_v9 = vmov 0.0  }
  0x17   : > { %967 = vset.pattern.permute.xlu1 %v1012_v6  ;;  %418 = vmatpush.msra.mxu3 %v1013_v7  ;;  %v357_v10 = vand.u32 4294901760, %v1086_v2  ;;  %v331_v18 = vlaneseq  ;;  %vm527_vm3 = vcmask 7168  }
  0x18   : > { %498 = vperm.xlu1 %967, %v1088_v3   ;;  %333 = vmatpush.msra.mxu0 %v1013_v7  ;;  %v350_v8 = vsub.f32 %v1084_v1, %v1095_v5 }
  0x19   : > { %419 = vmatpush.msra.mxu3 %v1013_v7  ;;  %406 = vmatpush.msra.mxu2 %v1014_v9  ;;  %v358_v11 = vsub.f32 %v1086_v2, %v357_v10  ;;  %v332_v19 = vand.u32 127, %v331_v18 }
  0x1a   : > { %334 = vmatpush.msra.mxu0 %v1013_v7  ;;  %409 = vmatmul.f32.vlgmr.msra.gmra.mxu2 %v350_v8  ;;  %v351_v12 = vand.u32 4294901760, %v350_v8 }
  0x1b   : > { %472 = vmatpush.msrb.mxu2 %v1013_v7  ;;  %420 = vmatpush.msra.mxu3 %v1013_v7  ;;  %v359_v15 = vand.u32 4294901760, %v358_v11 }
  0x1c   : > { %335 = vmatpush.msra.mxu0 %v1013_v7  ;;  %381 = vmatpush.msra.mxu1 %v1014_v9  ;;  %v352_v13 = vsub.f32 %v350_v8, %v351_v12 }
  0x1d   : > { %473 = vmatpush.msrb.mxu2 %v1013_v7  ;;  %421 = vmatpush.msra.mxu3 %v1013_v7  ;;  %v360_v16 = vsub.f32 %v358_v11, %v359_v15 }
  0x1e   : > { %315 = vmax.xlane.f32.xlu0 %v1086_v2  ;;  %336 = vmatpush.msra.mxu0 %v1013_v7  ;;  %v353_v14 = vand.u32 4294901760, %v352_v13 }
  0x1f   : > { %422 = vmatpush.msra.mxu3 %v1013_v7  ;;  %474 = vmatpush.msrb.mxu2 %v1013_v7  ;;  %v361_v17 = vand.u32 4294901760, %v360_v16 }
  0x20   : > { %501 = vperm.xlu1 %967, %v1090_v4   ;;  %337 = vmatpush.msra.mxu0 %v1013_v7 }
  0x21   : > { %423 = vmatpush.msra.mxu3 %v1013_v7  ;;  %475 = vmatpush.msrb.mxu2 %v1013_v7 }
  0x22   : > { %338 = vmatpush.msra.mxu0 %v1013_v7  ;;  %383 = vmatmul.f32.vlgmr.msra.gmra.mxu1 %v1095_v5 }
  0x23   : > { %424 = vmatpush.msra.mxu3 %v1013_v7  ;;  %476 = vmatpush.msrb.mxu2 %v1013_v7 }
  0x24   : > { %339 = vmatpush.msra.mxu0 %v1013_v7  ;;  %414 = vmatmul.f32.gmra.mxu2 %v358_v11 }
  0x25   : > { %425 = vmatpush.msra.mxu3 %v1013_v7  ;;  %477 = vmatpush.msrb.mxu2 %v1013_v7 }
  0x26   : > { %340 = vmatpush.msra.mxu0 %v1013_v7  ;;  %462 = vmatpush.msrb.mxu1 %v1014_v9 }
  0x27   : > { %426 = vmatpush.msra.mxu3 %v1013_v7  ;;  %478 = vmatpush.msrb.mxu2 %v1013_v7 }
  0x28   : > { %341 = vmatpush.msra.mxu0 %v1013_v7  ;;  %968 = vset.pattern.permute.xlu0 %v1012_v6 }
  0x29   : > { %427 = vmatpush.msra.mxu3 %v1013_v7  ;;  %479 = vmatpush.msrb.mxu2 %v1013_v7 }
  0x2a   : > { %342 = vmatpush.msra.mxu0 %v1013_v7  ;;  %387 = vmatmul.f32.gmra.mxu1 %v357_v10 }
  0x2b   : > { %428 = vmatpush.msra.mxu3 %v1013_v7  ;;  %480 = vmatpush.msrb.mxu2 %v1013_v7 }
  0x2c   : > { %343 = vmatpush.msra.mxu0 %v1013_v7 }
  0x2d   : > { %429 = vmatpush.msra.mxu3 %v1013_v7  ;;  %481 = vmatpush.msrb.mxu2 %v1013_v7 }
  0x2e   : > { %344 = vmatpush.msra.mxu0 %v1013_v7 }
  0x2f   : > { %430 = vmatpush.msra.mxu3 %v1013_v7  ;;  %482 = vmatpush.msrb.mxu2 %v1013_v7 }
  0x30   : > { %345 = vmatpush.msra.mxu0 %v1013_v7 }
  0x31   : > { %431 = vmatpush.msra.mxu3 %v1013_v7  ;;  %483 = vmatpush.msrb.mxu2 %v1013_v7 }
  0x32   : > { %346 = vmatpush.msra.mxu0 %v1013_v7  ;;  %464 = vmatmul.f32.vlgmr.msrb.gmra.mxu1 %v1095_v5 }
  0x33   : > { %432 = vmatpush.msra.mxu3 %v1013_v7  ;;  %484 = vmatpush.msrb.mxu2 %v1013_v7 }
  0x34   : > { %347 = vmatpush.msra.mxu0 %v1013_v7 }
  0x35   : > { %433 = vmatpush.msra.mxu3 %v1013_v7  ;;  %485 = vmatpush.msrb.mxu2 %v1013_v7 }
  0x36   : > { %437 = vmatmul.f32.vlgmr.msra.gmra.mxu3 %v351_v12  ;;  %348 = vmatpush.msra.mxu0 %v1013_v7 }
  0x37   : > { %486 = vmatpush.msrb.mxu2 %v1013_v7  ;;  %354 = vmatmul.f32.vlgmr.msra.gmra.mxu0 %v353_v14 }
  0x39   : > { %487 = vmatpush.msrb.mxu2 %v1013_v7 }
  0x3a   : > { %489 = vmatmul.f32.vlgmr.msrb.gmra.mxu2 %v1095_v5  ;;  %468 = vmatmul.f32.gmra.mxu1 %v357_v10 }
  0x3e   : > { %443 = vmatmul.f32.gmra.mxu3 %v359_v15 }
  0x3f   : > { %362 = vmatmul.f32.gmra.mxu0 %v361_v17 }
  0x42   : > { %493 = vmatmul.f32.gmra.mxu2 %v357_v10 }
  0x89   : > { %v314_v20 = vpop.xlane.xlu0 %313 }
  0x8a   : > { %v499_v21 = vpop.permute.xlu1 %498  ;;  %v317_v22 = vsub.f32 %v1084_v1, %v314_v20 }
  0x8b   : > { %vm503_vm1 = vcmp.eq.s32.totalorder %v332_v19, %v499_v21 }
  0x8c   : > { %v505_v23 = vsel %vm503_vm1, %v1084_v1, 0.0  ;;  %v319_v24 = vmul.f32 1.442695, %v317_v22 }
  0x8d   : > { %507 = vadd.xlane.f32.xlu0 %v505_v23 }
  0x8e   : > { %969 = vpow2.f32 %v319_v24 }
  0x91   : > { %v316_v25 = vpop.xlane.xlu0 %315 }
  0x92   : > { %v318_v26 = vsub.f32 %v1086_v2, %v316_v25  ;;  %v502_v27 = vpop.permute.xlu1 %501 }
  0x93   : > { %vm504_vm2 = vcmp.eq.s32.totalorder %v332_v19, %v502_v27 }
  0x94   : > { %v970_v28 = vpop.eup %969  ;;  %v321_v29 = vmul.f32 1.442695, %v318_v26  ;;  %v506_v30 = vsel %vm504_vm2, %v1086_v2, 0.0 }
  0x95   : > { %323 = vadd.xlane.f32.xlu2 %v970_v28  ;;  %509 = vadd.xlane.f32.xlu1 %v506_v30 }
  0x96   : > { %971 = vpow2.f32 %v321_v29 }
  0x9c   : > { %v972_v31 = vpop.eup %971 }
  0x9d   : > { %325 = vadd.xlane.f32.xlu2 %v972_v31  ;;  %v410_v33 = vpop.f32.mrf.mxu2  ;;  %v550_v31 = vld [vmem:[#allocation3] sm:$0x1] }
  0x9f   : > { %v384_v32 = vpop.f32.mrf.mxu1 }
  0xa7   : > { %v388_v35 = vpop.f32.mrf.mxu1  ;;  %v415_v36 = vpop.f32.mrf.mxu2 }
  0xaf   : > { %v465_v42 = vpop.f32.mrf.mxu1 }
  0xb4   : > { %v355_v34 = vpop.f32.mrf.mxu0 }
  0xb5   : > { %v385_v37 = vadd.f32 %v384_v32, %v355_v34 }
  0xb7   : > { %v411_v41 = vadd.f32 %v410_v33, %v385_v37  ;;  %v469_v58 = vpop.f32.mrf.mxu1  ;;  %v546_v37 = vld [vmem:[#allocation2] sm:$0x1] }
  0xb9   : > { %v438_v38 = vpop.f32.mrf.mxu3 }
  0xba   : > { %v439_v44 = vadd.f32 %v438_v38, %v411_v41 }
  0xbc   : > { %v363_v40 = vpop.f32.mrf.mxu0  ;;  %v466_v52 = vadd.f32 %v465_v42, %v439_v44 }
  0xbd   : > { %v389_v43 = vadd.f32 %v388_v35, %v363_v40  ;;  %v490_v46 = vpop.f32.mrf.mxu2 }
  0xbe   : > { %v491_v60 = vadd.f32 %v490_v46, %v466_v52 }
  0xbf   : > { %v416_v48 = vadd.f32 %v415_v36, %v389_v43 }
  0xc1   : > { %v444_v51 = vpop.f32.mrf.mxu3 }
  0xc2   : > { %v445_v56 = vadd.f32 %v444_v51, %v416_v48 }
  0xc4   : > { %v470_v0 = vadd.f32 %v469_v58, %v445_v56 }
  0xc5   : > { %v494_v6 = vpop.f32.mrf.mxu2 }
  0xc6   : > { %v495_v13 = vadd.f32 %v494_v6, %v470_v0 }
 0x100   : > { %v508_v50 = vpop.xlane.xlu0 %507 }
 0x101   : > { %v521_v54 = vsub.f32 %v508_v50, %v314_v20 }
 0x108   : > { %v324_v39 = vpop.xlane.xlu2 %323  ;;  %v510_v57 = vpop.xlane.xlu1 %509 }
 0x109   : > { %973 = vlog2.f32 %v324_v39  ;;  %v522_v62 = vsub.f32 %v510_v57, %v316_v25 }
 0x10f   : > { %v974_v45 = vpop.eup %973 }
 0x110   : > { %v328_v47 = vmul.f32 0.6931472, %v974_v45  ;;  %v326_v49 = vpop.xlane.xlu2 %325 }
 0x111   : > { %975 = vlog2.f32 %v326_v49 }
 0x112   : > { %v511_v53 = vadd.f32 %v328_v47, %v314_v20  ;;  %v523_v59 = vsub.f32 %v521_v54, %v328_v47 }
 0x114   : > { %v513_v55 = vmul.f32 128.0, %v511_v53  ;;  %v525_v7 = vadd.f32 1e-06, %v523_v59 }
 0x116   : > { %v515_v63 = vsub.f32 %v491_v60, %v513_v55  ;;  %v537_v14 = vsub.f32 0.0, %v525_v7 }
 0x117   : > { %v976_v61 = vpop.eup %975 }
 0x118   : > { %v330_v5 = vmul.f32 0.6931472, %v976_v61  ;;  %v517_v10 = vadd.f32 0.000128, %v515_v63 }
 0x11a   : > { %v512_v8 = vadd.f32 %v330_v5, %v316_v25  ;;  %v524_v9 = vsub.f32 %v522_v62, %v330_v5  ;;  %v519_v17 = vsub.f32 0.0, %v517_v10 }
 0x11c   : > { %v514_v11 = vmul.f32 128.0, %v512_v8  ;;  %v526_v12 = vadd.f32 1e-06, %v524_v9  ;;  %v528_v22 = vsel %vm527_vm3, %v519_v17, 0.0 }
 0x11e   : > { %v538_v15 = vsub.f32 0.0, %v526_v12  ;;  %v516_v16 = vsub.f32 %v495_v13, %v514_v11 }
 0x120   : > { %v539_v18 = vadd.f32 %v538_v15, %v537_v14  ;;  %v518_v19 = vadd.f32 0.000128, %v516_v16 }
 0x122   : > { %v540_v20 = vrot.slane %v539_v18, 4  ;;  %v520_v21 = vsub.f32 0.0, %v518_v19 }
 0x124   : > { %v541_v23 = vadd.f32 %v540_v20, %v539_v18  ;;  %v529_v24 = vsel %vm527_vm3, %v520_v21, 0.0 }
 0x125   : > { %v530_v26 = vadd.f32 %v529_v24, %v528_v22 }
 0x126   : > { %v542_v27 = vrot.slane %v541_v23, 2 }
 0x127   : > { %v531_v25 = vrot.slane %v530_v26, 4 }
 0x128   : > { %v543_v28 = vadd.f32 %v542_v27, %v541_v23 }
 0x129   : > { %v532_v29 = vadd.f32 %v531_v25, %v530_v26 }
 0x12a   : > { %v544_v30 = vrot.slane %v543_v28, 1 }
 0x12b   : > { %v533_v32 = vrot.slane %v532_v29, 2 }
 0x12c   : > { %v545_v33 = vadd.f32 %v544_v30, %v543_v28 }
 0x12d   : > { %v534_v34 = vadd.f32 %v533_v32, %v532_v29 }
 0x12e   : > { %v551_v35 = vadd.f32 %v550_v31, %v545_v33 }
 0x12f   : > { %v535_v36 = vrot.slane %v534_v34, 1 }
 0x130   : > { %552 = vst.msk [vmem:[#allocation3] sm:$0x1] %vm298_vm0, %v551_v35 }
 0x131   : > { %v536_v38 = vadd.f32 %v535_v36, %v534_v34 }
 0x133   : > { %v547_v39 = vadd.f32 %v546_v37, %v536_v38 }
 0x135   : > { %549 = vst.msk [vmem:[#allocation2] sm:$0x1] %vm298_vm0, %v547_v39 }
 0x136 PF: > { %p928_p7 = scmp.le.s32.totalorder %s1063_s17, 24 }
 0x138   : > { %555 = sbr.rel (%p928_p7) target bundleno = 615 (0x267), region = 40 }
 0x13d   : > { %v557_v40 = vlaneseq  ;;  %v1015_v41 = vmov 0   ;;  %v560_v42 = vstv %s934_s16  ;;  %v1016_v43 = vmov 1.0  }
 0x13e   : > { %977 = vset.pattern.permute.xlu1 %v1015_v41  ;;  %676 = vmatpush.msra.mxu3 %v1016_v43  ;;  %v1017_v45 = vmov 0.0   ;;  %vm789_vm8 = vcmask 7168  }
 0x13f   : > { %756 = vperm.xlu1 %977, %v1088_v3   ;;  %v558_v44 = vshrl.u32 %v557_v40, 7  ;;  %591 = vmatpush.msra.mxu0 %v1016_v43  ;;  %v590_v57 = vand.u32 127, %v557_v40 }
 0x140   : > { %677 = vmatpush.msra.mxu3 %v1016_v43  ;;  %664 = vmatpush.msra.mxu2 %v1017_v45 }
 0x141   : > { %v1170_v46 = vadd.s32 %v560_v42, %v558_v44  ;;  %v559_v47 = vadd.s32 8, %v558_v44  ;;  %592 = vmatpush.msra.mxu0 %v1016_v43  ;;  %639 = vmatpush.msra.mxu1 %v1017_v45 }
 0x142   : > { %730 = vmatpush.msrb.mxu2 %v1016_v43  ;;  %678 = vmatpush.msra.mxu3 %v1016_v43 }
 0x143   : > { %vm563_vm4 = vcmp.lt.s32.totalorder %v1170_v46, 24  ;;  %v1177_v3 = vadd.s32 %v560_v42, %v559_v47  ;;  %593 = vmatpush.msra.mxu0 %v1016_v43  ;;  %720 = vmatpush.msrb.mxu1 %v1017_v45 }
 0x144   : > { %731 = vmatpush.msrb.mxu2 %v1016_v43  ;;  %v1184_v48 = vsel %vm563_vm4, %v1084_v1, 0.0  ;;  %679 = vmatpush.msra.mxu3 %v1016_v43 }
 0x145   : > { %571 = vmax.xlane.f32.xlu0 %v1184_v48  ;;  %vm564_vm5 = vcmp.lt.s32.totalorder %v1177_v3, 24  ;;  %594 = vmatpush.msra.mxu0 %v1016_v43  ;;  %v607_v49 = vand.u32 4294901760, %v1184_v48 }
 0x146   : > { %680 = vmatpush.msra.mxu3 %v1016_v43  ;;  %732 = vmatpush.msrb.mxu2 %v1016_v43  ;;  %v1200_v50 = vsel %vm564_vm5, %v1086_v2, 0.0 }
 0x147   : > { %759 = vperm.xlu1 %977, %v1090_v4   ;;  %595 = vmatpush.msra.mxu0 %v1016_v43  ;;  %v608_v1 = vsub.f32 %v1184_v48, %v607_v49  ;;  %v615_v51 = vand.u32 4294901760, %v1200_v50 }
 0x148   : > { %681 = vmatpush.msra.mxu3 %v1016_v43  ;;  %733 = vmatpush.msrb.mxu2 %v1016_v43 }
 0x149   : > { %596 = vmatpush.msra.mxu0 %v1016_v43  ;;  %667 = vmatmul.f32.vlgmr.msra.gmra.mxu2 %v608_v1  ;;  %v616_v2 = vsub.f32 %v1200_v50, %v615_v51  ;;  %v609_v4 = vand.u32 4294901760, %v608_v1 }
 0x14a   : > { %682 = vmatpush.msra.mxu3 %v1016_v43  ;;  %734 = vmatpush.msrb.mxu2 %v1016_v43 }
 0x14b   : > { %597 = vmatpush.msra.mxu0 %v1016_v43  ;;  %641 = vmatmul.f32.vlgmr.msra.gmra.mxu1 %v607_v49  ;;  %v610_v52 = vsub.f32 %v608_v1, %v609_v4  ;;  %v617_v54 = vand.u32 4294901760, %v616_v2 }
 0x14c   : > { %683 = vmatpush.msra.mxu3 %v1016_v43  ;;  %735 = vmatpush.msrb.mxu2 %v1016_v43 }
 0x14d   : > { %573 = vmax.xlane.f32.xlu0 %v1200_v50  ;;  %598 = vmatpush.msra.mxu0 %v1016_v43  ;;  %v611_v53 = vand.u32 4294901760, %v610_v52  ;;  %v618_v55 = vsub.f32 %v616_v2, %v617_v54  ;;  %v930_v52 = vsel %vm563_vm4, 1.0, %v1017_v45 }
 0x14e   : > { %684 = vmatpush.msra.mxu3 %v1016_v43  ;;  %736 = vmatpush.msrb.mxu2 %v1016_v43 }
 0x14f   : > { %599 = vmatpush.msra.mxu0 %v1016_v43  ;;  %978 = vset.pattern.permute.xlu0 %v1015_v41  ;;  %v619_v56 = vand.u32 4294901760, %v618_v55 }
 0x150   : > { %685 = vmatpush.msra.mxu3 %v1016_v43  ;;  %737 = vmatpush.msrb.mxu2 %v1016_v43 }
 0x151   : > { %600 = vmatpush.msra.mxu0 %v1016_v43  ;;  %672 = vmatmul.f32.gmra.mxu2 %v616_v2 }
 0x152   : > { %686 = vmatpush.msra.mxu3 %v1016_v43  ;;  %738 = vmatpush.msrb.mxu2 %v1016_v43 }
 0x153   : > { %601 = vmatpush.msra.mxu0 %v1016_v43  ;;  %645 = vmatmul.f32.gmra.mxu1 %v615_v51 }
 0x154   : > { %687 = vmatpush.msra.mxu3 %v1016_v43  ;;  %739 = vmatpush.msrb.mxu2 %v1016_v43 }
 0x155   : > { %602 = vmatpush.msra.mxu0 %v1016_v43 }
 0x156   : > { %688 = vmatpush.msra.mxu3 %v1016_v43  ;;  %740 = vmatpush.msrb.mxu2 %v1016_v43 }
 0x157   : > { %603 = vmatpush.msra.mxu0 %v1016_v43 }
 0x158   : > { %689 = vmatpush.msra.mxu3 %v1016_v43  ;;  %741 = vmatpush.msrb.mxu2 %v1016_v43 }
 0x159   : > { %604 = vmatpush.msra.mxu0 %v1016_v43 }
 0x15a   : > { %690 = vmatpush.msra.mxu3 %v1016_v43  ;;  %742 = vmatpush.msrb.mxu2 %v1016_v43 }
 0x15b   : > { %605 = vmatpush.msra.mxu0 %v1016_v43  ;;  %722 = vmatmul.f32.vlgmr.msrb.gmra.mxu1 %v607_v49 }
 0x15c   : > { %691 = vmatpush.msra.mxu3 %v1016_v43  ;;  %743 = vmatpush.msrb.mxu2 %v1016_v43 }
 0x15d   : > { %606 = vmatpush.msra.mxu0 %v1016_v43  ;;  %695 = vmatmul.f32.vlgmr.msra.gmra.mxu3 %v609_v4 }
 0x15e   : > { %744 = vmatpush.msrb.mxu2 %v1016_v43  ;;  %612 = vmatmul.f32.vlgmr.msra.gmra.mxu0 %v611_v53  ;;  %v931_v53 = vsel %vm564_vm5, 1.0, %v1017_v45 }
 0x160   : > { %745 = vmatpush.msrb.mxu2 %v1016_v43 }
 0x161   : > { %747 = vmatmul.f32.vlgmr.msrb.gmra.mxu2 %v607_v49 }
 0x163   : > { %726 = vmatmul.f32.gmra.mxu1 %v615_v51 }
 0x165   : > { %701 = vmatmul.f32.gmra.mxu3 %v617_v54 }
 0x166   : > { %620 = vmatmul.f32.gmra.mxu0 %v619_v56 }
 0x169   : > { %751 = vmatmul.f32.gmra.mxu2 %v615_v51 }
 0x1b1   : > { %v757_v58 = vpop.permute.xlu1 %756 }
 0x1b2   : > { %vm761_vm6 = vcmp.eq.s32.totalorder %v590_v57, %v757_v58 }
 0x1b3   : > { %v763_v59 = vsel %vm761_vm6, %v1184_v48, 0.0 }
 0x1b4   : > { %765 = vadd.xlane.f32.xlu0 %v763_v59 }
 0x1b8   : > { %v572_v60 = vpop.xlane.xlu0 %571 }
 0x1b9   : > { %v760_v61 = vpop.permute.xlu1 %759  ;;  %v575_v62 = vsub.f32 %v1184_v48, %v572_v60 }
 0x1ba   : > { %vm762_vm7 = vcmp.eq.s32.totalorder %v590_v57, %v760_v61 }
 0x1bb   : > { %v764_v63 = vsel %vm762_vm7, %v1200_v50, 0.0  ;;  %v577_v0 = vmul.f32 1.442695, %v575_v62 }
 0x1bc   : > { %767 = vadd.xlane.f32.xlu1 %v764_v63 }
 0x1bd   : > { %979 = vpow2.f32 %v577_v0 }
 0x1c0   : > { %v574_v5 = vpop.xlane.xlu0 %573 }
 0x1c1   : > { %v576_v6 = vsub.f32 %v1200_v50, %v574_v5 }
 0x1c3   : > { %v980_v7 = vpop.eup %979  ;;  %v579_v8 = vmul.f32 1.442695, %v576_v6 }
 0x1c4   : > { %581 = vadd.xlane.f32.xlu2 %v980_v7 }
 0x1c5   : > { %981 = vpow2.f32 %v579_v8 }
 0x1c8   : > { %v642_v10 = vpop.f32.mrf.mxu1 }
 0x1cb   : > { %v982_v9 = vpop.eup %981 }
 0x1cc   : > { %583 = vadd.xlane.f32.xlu2 %v982_v9  ;;  %v668_v11 = vpop.f32.mrf.mxu2 }
 0x1d0   : > { %v646_v13 = vpop.f32.mrf.mxu1 }
 0x1d4   : > { %v673_v15 = vpop.f32.mrf.mxu2 }
 0x1d8   : > { %v723_v20 = vpop.f32.mrf.mxu1 }
 0x1db   : > { %v613_v12 = vpop.f32.mrf.mxu0 }
 0x1dc   : > { %v643_v14 = vadd.f32 %v642_v10, %v613_v12 }
 0x1de   : > { %v669_v17 = vadd.f32 %v668_v11, %v643_v14  ;;  %v814_v11 = vld [vmem:[#allocation3] sm:$0x1] }
 0x1e0   : > { %v696_v16 = vpop.f32.mrf.mxu3  ;;  %v727_v38 = vpop.f32.mrf.mxu1 }
 0x1e1   : > { %v697_v21 = vadd.f32 %v696_v16, %v669_v17  ;;  %v810_v17 = vld [vmem:[#allocation2] sm:$0x1] }
 0x1e3   : > { %v621_v19 = vpop.f32.mrf.mxu0  ;;  %v724_v27 = vadd.f32 %v723_v20, %v697_v21 }
 0x1e4   : > { %v647_v22 = vadd.f32 %v646_v13, %v621_v19  ;;  %v748_v26 = vpop.f32.mrf.mxu2 }
 0x1e5   : > { %v749_v34 = vadd.f32 %v748_v26, %v724_v27 }
 0x1e6   : > { %v674_v28 = vadd.f32 %v673_v15, %v647_v22 }
 0x1e8   : > { %v702_v30 = vpop.f32.mrf.mxu3 }
 0x1e9   : > { %v703_v36 = vadd.f32 %v702_v30, %v674_v28 }
 0x1eb   : > { %v728_v43 = vadd.f32 %v727_v38, %v703_v36 }
 0x1ec   : > { %v752_v47 = vpop.f32.mrf.mxu2 }
 0x1ed   : > { %v753_v4 = vadd.f32 %v752_v47, %v728_v43 }
 0x227   : > { %v766_v24 = vpop.xlane.xlu0 %765 }
 0x228   : > { %v779_v31 = vsub.f32 %v766_v24, %v572_v60 }
 0x22f   : > { %v768_v37 = vpop.xlane.xlu1 %767 }
 0x230   : > { %v780_v41 = vsub.f32 %v768_v37, %v574_v5 }
 0x237   : > { %v582_v18 = vpop.xlane.xlu2 %581 }
 0x238   : > { %983 = vlog2.f32 %v582_v18 }
 0x23e   : > { %v984_v23 = vpop.eup %983 }
 0x23f   : > { %v586_v25 = vmul.f32 0.6931472, %v984_v23  ;;  %v584_v29 = vpop.xlane.xlu2 %583 }
 0x240   : > { %985 = vlog2.f32 %v584_v29 }
 0x241   : > { %v769_v32 = vadd.f32 %v586_v25, %v572_v60  ;;  %v781_v33 = vsub.f32 %v779_v31, %v586_v25 }
 0x243   : > { %v771_v35 = vmul.f32 128.0, %v769_v32  ;;  %v783_v42 = vadd.f32 1e-06, %v781_v33 }
 0x245   : > { %v773_v39 = vsub.f32 %v749_v34, %v771_v35  ;;  %v799_v50 = vsub.f32 0.0, %v783_v42 }
 0x246   : > { %v986_v40 = vpop.eup %985 }
 0x247   : > { %v588_v44 = vmul.f32 0.6931472, %v986_v40  ;;  %v775_v48 = vadd.f32 0.000128, %v773_v39  ;;  %v801_v57 = vmul.f32 %v930_v52, %v799_v50 }
 0x249   : > { %v770_v49 = vadd.f32 %v588_v44, %v574_v5  ;;  %v782_v1 = vsub.f32 %v780_v41, %v588_v44  ;;  %v777_v54 = vsub.f32 0.0, %v775_v48 }
 0x24b   : > { %v772_v51 = vmul.f32 128.0, %v770_v49  ;;  %v784_v2 = vadd.f32 1e-06, %v782_v1  ;;  %v787_v60 = vmul.f32 %v930_v52, %v777_v54 }
 0x24d   : > { %v800_v55 = vsub.f32 0.0, %v784_v2  ;;  %v774_v56 = vsub.f32 %v753_v4, %v772_v51  ;;  %v790_v5 = vsel %vm789_vm8, %v787_v60, 0.0 }
 0x24f   : > { %v802_v58 = vmul.f32 %v931_v53, %v800_v55  ;;  %v776_v59 = vadd.f32 0.000128, %v774_v56 }
 0x251   : > { %v803_v61 = vadd.f32 %v802_v58, %v801_v57  ;;  %v778_v62 = vsub.f32 0.0, %v776_v59 }
 0x253   : > { %v804_v63 = vrot.slane %v803_v61, 4  ;;  %v788_v0 = vmul.f32 %v931_v53, %v778_v62 }
 0x255   : > { %v805_v6 = vadd.f32 %v804_v63, %v803_v61  ;;  %v791_v46 = vsel %vm789_vm8, %v788_v0, 0.0 }
 0x256   : > { %v792_v7 = vadd.f32 %v791_v46, %v790_v5 }
 0x257   : > { %v806_v8 = vrot.slane %v805_v6, 2 }
 0x258   : > { %v793_v9 = vrot.slane %v792_v7, 4 }
 0x259   : > { %v807_v3 = vadd.f32 %v806_v8, %v805_v6 }
 0x25a   : > { %v794_v45 = vadd.f32 %v793_v9, %v792_v7 }
 0x25b   : > { %v808_v10 = vrot.slane %v807_v3, 1 }
 0x25c   : > { %v795_v12 = vrot.slane %v794_v45, 2 }
 0x25d   : > { %v809_v13 = vadd.f32 %v808_v10, %v807_v3 }
 0x25e   : > { %v796_v14 = vadd.f32 %v795_v12, %v794_v45 }
 0x25f   : > { %v815_v15 = vadd.f32 %v814_v11, %v809_v13 }
 0x260   : > { %v797_v16 = vrot.slane %v796_v14, 1 }
 0x261   : > { %816 = vst.msk [vmem:[#allocation3] sm:$0x1] %vm298_vm0, %v815_v15 }
 0x262   : > { %v798_v18 = vadd.f32 %v797_v16, %v796_v14 }
 0x264   : > { %v811_v19 = vadd.f32 %v810_v17, %v798_v18 }
 0x266   : > { %813 = vst.msk [vmem:[#allocation2] sm:$0x1] %vm298_vm0, %v811_v19 }
 0x267 PF:  {}
 0x268   : > { %v823_v21 = vld [vmem:[#allocation3] sm:$0x1] }
 0x269   : > { %824 = vst.msk [vmem:[%s293_s25] sm:$0x1] %vm298_vm0, %v823_v21 }
 0x26d   : > { %v820_v20 = vld [vmem:[#allocation2] sm:$0x1] }
 0x26e   : > { %822 = vst.msk [vmem:[%s290_s22] sm:$0x1] %vm298_vm0, %v820_v20 }
 0x26f PF: > { %s14_s14 = sadd.s32 1, %s1009_s14   ;;  %s1278_s12 = smov %s1005_s13 }
 0x270   : > { %p11_p8 = scmp.ge.s32.totalorder %s14_s14, 4   ;;  %s1279_s13 = smov %s1281_s15 }
 0x272   :  { %13 = sbr.rel (!%p11_p8) target bundleno = 2 (0x2), region = 89 }

</bundles_post_ra>
